<compile_context>
chip_gen: v7x
topology: tpu7x:2x2x1
jax: 0.10.0
libtpu: 0.0.40
codegen_flags: <defaults>
</compile_context>

<pallas_src>
import functools

import jax
import jax.numpy as jnp
from jax.experimental import pallas as pl
from jax.experimental.pallas import tpu as pltpu


_LANE = 128
_TARGET_BLOCK_BYTES = 2 * 1024 * 1024       # ~2 MiB: HBM-roofline sweet spot
_MAX_SINGLE_BLOCK_BYTES = 4 * 1024 * 1024   # upper end of the 1-4 MiB window
_MIN_GRID_STEPS = 8                         # >= 4 steps per v7x TensorCore
_VMEM_LIMIT_BYTES = 32 * 1024 * 1024        # small blocks -> modest scoped VMEM


def _round_down(x, m):
    return (x // m) * m


def _sublane_align(dtype):
    # Sub-32-bit dtypes pack along sublanes: bf16 vreg tile is [16,128],
    # int8/fp8 is [32,128]; f32 stays [8,128].
    return max(8, 32 // jnp.dtype(dtype).itemsize)


def _axis_tile(length, align, want):
    """An `align`-multiple tile close to `want`, clamped to [align, length].
    Returns the full `length` (always a legal block dim) when the tile would
    cover the whole axis."""
    t = max(_round_down(int(want), align), align)
    return length if t >= length else t


# ----------------------------------------------------------------------------
# Kernels
# ----------------------------------------------------------------------------
def _range_scale_kernel(x_ref, o_ref, *, reduce_axis):
    """Single-pass: the reduce axis is fully resident in this block."""
    x = x_ref[...]                                       # native dtype, no f32 copy
    mn = jnp.min(x, axis=reduce_axis, keepdims=True)     # exact in any dtype
    mx = jnp.max(x, axis=reduce_axis, keepdims=True)
    # One reciprocal per reduced slice (f32) + broadcast multiply instead of a
    # full-block elementwise divide.
    inv_rng = 1.0 / (mx - mn).astype(jnp.float32)
    o_ref[...] = ((x - mn) * inv_rng).astype(o_ref.dtype)


def _minmax_kernel(x_ref, mn_ref, mx_ref, *, reduce_axis, reduce_len,
                   reduce_tile):
    """Two-pass phase 1: accumulate per-slice min/max across the tiled reduce
    axis (the LAST grid axis)."""
    k = pl.program_id(1)
    x = x_ref[...]

    if reduce_len % reduce_tile != 0:
        # The final reduce-axis block is padded with garbage past the array
        # end; mask it so it cannot pollute the running min/max.
        valid = reduce_len - k * reduce_tile
        idx = jax.lax.broadcasted_iota(jnp.int32, x.shape, reduce_axis)
        in_bounds = idx < valid
        if jnp.issubdtype(x.dtype, jnp.floating):
            info = jnp.finfo(x.dtype)
        else:
            info = jnp.iinfo(x.dtype)
        hi = jnp.asarray(info.max, dtype=x.dtype)
        lo = jnp.asarray(info.min, dtype=x.dtype)
        x_for_min = jnp.where(in_bounds, x, hi)
        x_for_max = jnp.where(in_bounds, x, lo)
    else:
        x_for_min = x_for_max = x

    part_mn = jnp.min(x_for_min, axis=reduce_axis, keepdims=True)
    part_mx = jnp.max(x_for_max, axis=reduce_axis, keepdims=True)

    @pl.when(k == 0)
    def _():
        mn_ref[...] = part_mn
        mx_ref[...] = part_mx

    @pl.when(k != 0)
    def _():
        mn_ref[...] = jnp.minimum(mn_ref[...], part_mn)
        mx_ref[...] = jnp.maximum(mx_ref[...], part_mx)


def _apply_kernel(x_ref, mn_ref, mx_ref, o_ref):
    """Two-pass phase 2: apply (x - mn) * 1/(mx - mn)."""
    mn = mn_ref[...]
    inv_rng = 1.0 / (mx_ref[...] - mn).astype(jnp.float32)
    o_ref[...] = ((x_ref[...] - mn) * inv_rng).astype(o_ref.dtype)


# ----------------------------------------------------------------------------
# Wrappers
# ----------------------------------------------------------------------------
def _range_scale_single_pass(data, dim, elem_bytes, sub_align,
                             target_block_bytes):
    n, f = data.shape
    if dim == 0:
        # Reduce over rows (per-column stats): all N rows resident, tile the
        # feature (lane) axis in 128-multiples at ~target_block_bytes.
        want = max(target_block_bytes // (n * elem_bytes), _LANE)
        tile = _axis_tile(f, _LANE, want)
        if f >= _MIN_GRID_STEPS * _LANE:          # >= 4 steps per v7x core
            tile = min(tile, _axis_tile(f, _LANE, f // _MIN_GRID_STEPS))
        grid = (pl.cdiv(f, tile),)
        block = (n, tile)
        index_map = lambda j: (0, j)
    else:
        # Reduce over columns (per-row stats): full F resident, tile the row
        # (sublane) axis with dtype-aware packing alignment.
        want = max(target_block_bytes // (f * elem_bytes), sub_align)
        tile = _axis_tile(n, sub_align, want)
        if n >= _MIN_GRID_STEPS * sub_align:
            tile = min(tile, _axis_tile(n, sub_align, n // _MIN_GRID_STEPS))
        grid = (pl.cdiv(n, tile),)
        block = (tile, f)
        index_map = lambda i: (i, 0)

    kernel = functools.partial(_range_scale_kernel, reduce_axis=dim)
    return pl.pallas_call(
        kernel,
        out_shape=jax.ShapeDtypeStruct((n, f), data.dtype),
        grid_spec=pltpu.PrefetchScalarGridSpec(
            num_scalar_prefetch=0,
            grid=grid,
            in_specs=[pl.BlockSpec(block, index_map)],
            out_specs=pl.BlockSpec(block, index_map),
        ),
        compiler_params=pltpu.CompilerParams(
            dimension_semantics=("parallel",),
            vmem_limit_bytes=_VMEM_LIMIT_BYTES,
        ),
        cost_estimate=pl.CostEstimate(
            flops=5 * n * f, transcendentals=0,
            bytes_accessed=2 * n * f * elem_bytes),
    )(data)


def _range_scale_two_pass(data, dim, elem_bytes, sub_align,
                          target_block_bytes):
    n, f = data.shape
    dtype = data.dtype

    if dim == 0:
        # Reduce over rows: tile both axes; lane tile up to 512, then size the
        # (tiled) reduce axis to hit ~target_block_bytes.
        f_tile = _axis_tile(f, _LANE, 512)
        if f >= 2 * _LANE:                         # >= 2 parallel blocks
            f_tile = min(f_tile, _axis_tile(f, _LANE, f // 2))
        n_tile = _axis_tile(
            n, sub_align,
            max(target_block_bytes // (f_tile * elem_bytes), sub_align))
        reduce_tile, grid_reduce = n_tile, pl.cdiv(n, n_tile)
        grid_other = pl.cdiv(f, f_tile)
        stat_shape, stat_block = (1, f), (1, f_tile)
        x_map_p1 = lambda j, k: (k, j)
        stat_map_p1 = lambda j, k: (0, j)
        stat_map_p2 = lambda i, j: (0, j)
    else:
        # Reduce over columns.
        n_tile = _axis_tile(n, sub_align, 256)
        if n >= 2 * sub_align:
            n_tile = min(n_tile, _axis_tile(n, sub_align, n // 2))
        f_tile = _axis_tile(
            f, _LANE,
            max(target_block_bytes // (n_tile * elem_bytes), _LANE))
        reduce_tile, grid_reduce = f_tile, pl.cdiv(f, f_tile)
        grid_other = pl.cdiv(n, n_tile)
        stat_shape, stat_block = (n, 1), (n_tile, 1)
        x_map_p1 = lambda i, k: (i, k)
        stat_map_p1 = lambda i, k: (i, 0)
        stat_map_p2 = lambda i, j: (i, 0)

    x_block = (n_tile, f_tile)
    x_map_p2 = lambda i, j: (i, j)
    reduce_len = n if dim == 0 else f

    # ---- Phase 1: per-slice min/max (reduce axis last in grid, "arbitrary").
    mn, mx = pl.pallas_call(
        functools.partial(_minmax_kernel, reduce_axis=dim,
                          reduce_len=reduce_len, reduce_tile=reduce_tile),
        out_shape=(jax.ShapeDtypeStruct(stat_shape, dtype),
                   jax.ShapeDtypeStruct(stat_shape, dtype)),
        grid_spec=pltpu.PrefetchScalarGridSpec(
            num_scalar_prefetch=0,
            grid=(grid_other, grid_reduce),
            in_specs=[pl.BlockSpec(x_block, x_map_p1)],
            out_specs=[pl.BlockSpec(stat_block, stat_map_p1),
                       pl.BlockSpec(stat_block, stat_map_p1)],
        ),
        compiler_params=pltpu.CompilerParams(
            dimension_semantics=("parallel", "arbitrary"),
            vmem_limit_bytes=_VMEM_LIMIT_BYTES,
        ),
        cost_estimate=pl.CostEstimate(
            flops=2 * n * f, transcendentals=0,
            bytes_accessed=n * f * elem_bytes),
    )(data)

    # ---- Phase 2: apply scaling on a fully parallel tiled grid.
    return pl.pallas_call(
        _apply_kernel,
        out_shape=jax.ShapeDtypeStruct((n, f), dtype),
        grid_spec=pltpu.PrefetchScalarGridSpec(
            num_scalar_prefetch=0,
            grid=(pl.cdiv(n, n_tile), pl.cdiv(f, f_tile)),
            in_specs=[pl.BlockSpec(x_block, x_map_p2),
                      pl.BlockSpec(stat_block, stat_map_p2),
                      pl.BlockSpec(stat_block, stat_map_p2)],
            out_specs=pl.BlockSpec(x_block, x_map_p2),
        ),
        compiler_params=pltpu.CompilerParams(
            dimension_semantics=("parallel", "parallel"),
            vmem_limit_bytes=_VMEM_LIMIT_BYTES,
        ),
        cost_estimate=pl.CostEstimate(
            flops=3 * n * f, transcendentals=0,
            bytes_accessed=2 * n * f * elem_bytes),
    )(data, mn, mx)


def range_scale(data: jax.Array, dim: int, *,
                max_single_block_bytes: int = _MAX_SINGLE_BLOCK_BYTES,
                target_block_bytes: int = _TARGET_BLOCK_BYTES) -> jax.Array:
    """(data - min) / (max - min) with min/max taken over `dim` (0 or 1)."""
    if dim not in (0, 1):
        raise ValueError(f"`dim` must be 0 or 1, got dim={dim}")
    if data.ndim != 2:
        raise ValueError(f"expected 2-D input, got shape {data.shape}")

    n, f = data.shape
    elem_bytes = jnp.dtype(data.dtype).itemsize
    sub_align = _sublane_align(data.dtype)

    if dim == 0:
        reduce_len, other_len, other_align = n, f, _LANE
    else:
        reduce_len, other_len, other_align = f, n, sub_align

    # Single pass only if a minimum-width block (reduce axis fully resident)
    # stays inside the 1-4 MiB block window; otherwise tile the reduce axis.
    min_single_block = reduce_len * min(other_align, other_len) * elem_bytes
    if min_single_block <= max_single_block_bytes:
        return _range_scale_single_pass(data, dim, elem_bytes, sub_align,
                                        target_block_bytes)
    return _range_scale_two_pass(data, dim, elem_bytes, sub_align,
                                 target_block_bytes)


# ----------------------------------------------------------------------------
# Demo / correctness check
# ----------------------------------------------------------------------------
if __name__ == "__main__":
    key = jax.random.PRNGKey(0)
    k1, k2 = jax.random.split(key)

    # Small (samples, features) inputs consistent with the module. The second
    # case forces the two-pass (tiled-reduction) path with tiny tiles so the
    # accumulator + edge-block masking logic is exercised on TPU.
    cases = [
        (jax.random.normal(k1, (64, 256), jnp.float32) * 3.0 + 1.5, {}),
        (jax.random.normal(k2, (100, 200), jnp.float32) * 2.0 - 0.5,
         dict(max_single_block_bytes=1, target_block_bytes=8 * 128 * 4)),
    ]

    ok = True
    for data, kwargs in cases:
        for dim in (0, 1):
            out = jax.block_until_ready(range_scale(data, dim, **kwargs))

            # Pure-JAX reference with identical semantics to the PyTorch module.
            mn = jnp.min(data, axis=dim, keepdims=True)
            mx = jnp.max(data, axis=dim, keepdims=True)
            ref = (data - mn) / (mx - mn)

            ok &= out.shape == data.shape and out.dtype == data.dtype
            ok &= bool(jnp.allclose(out, ref, atol=1e-6, rtol=1e-5))

    assert ok
    print("KERNEL_OK")
</pallas_src>

<mosaic_0001>
module attributes {stable_mosaic.version = 11 : i64} {
  func.func @_range_scale_kernel(%arg0: i32, %arg1: memref<64x256xf32, #tpu.memory_space<vmem>>, %arg2: memref<64x256xf32, #tpu.memory_space<vmem>>) attributes {dimension_semantics = [#tpu.dimension_semantics<parallel>], iteration_bounds = array<i64: 1>, scalar_prefetch = 0 : i64, scratch_operands = 0 : i64, tpu.core_type = #tpu.core_type<tc>, window_params = [{transform_indices = @transform_0, window_bounds = array<i64: 64, 256>}, {transform_indices = @transform_1, window_bounds = array<i64: 64, 256>}]} {
    %c0 = arith.constant 0 : index
    %c0_0 = arith.constant 0 : index
    %0 = vector.load %arg1[%c0, %c0_0] : memref<64x256xf32, #tpu.memory_space<vmem>>, vector<64x256xf32>
    %cst = arith.constant dense<0x7F800000> : vector<256xf32>
    %1 = vector.multi_reduction <minimumf>, %0, %cst [0] : vector<64x256xf32> to vector<256xf32>
    %2 = vector.shape_cast %1 : vector<256xf32> to vector<1x256xf32>
    %cst_1 = arith.constant dense<0xFF800000> : vector<256xf32>
    %3 = vector.multi_reduction <maximumf>, %0, %cst_1 [0] : vector<64x256xf32> to vector<256xf32>
    %4 = vector.shape_cast %3 : vector<256xf32> to vector<1x256xf32>
    %5 = arith.subf %4, %2 : vector<1x256xf32>
    %cst_2 = arith.constant 1.000000e+00 : f32
    %6 = vector.broadcast %cst_2 : f32 to vector<1x256xf32>
    %7 = arith.divf %6, %5 : vector<1x256xf32>
    %8 = vector.broadcast %2 : vector<1x256xf32> to vector<64x256xf32>
    %9 = arith.subf %0, %8 : vector<64x256xf32>
    %10 = vector.broadcast %7 : vector<1x256xf32> to vector<64x256xf32>
    %11 = arith.mulf %9, %10 : vector<64x256xf32>
    %c0_3 = arith.constant 0 : index
    %c0_4 = arith.constant 0 : index
    %12 = vector.load %arg2[%c0_3, %c0_4] : memref<64x256xf32, #tpu.memory_space<vmem>>, vector<64x256xf32>
    tpu.vector_store %arg2[%c0_3, %c0_4], %11 {strides = array<i32>} : memref<64x256xf32, #tpu.memory_space<vmem>>, vector<64x256xf32>,
    return
  }
  func.func @transform_0(%arg0: i32) -> (i32, i32) {
    %c0_i32 = arith.constant 0 : i32
    %c0_i32_0 = arith.constant 0 : i32
    return %c0_i32, %arg0 : i32, i32
  }
  func.func @transform_1(%arg0: i32) -> (i32, i32) {
    %c0_i32 = arith.constant 0 : i32
    %c0_i32_0 = arith.constant 0 : i32
    return %c0_i32, %arg0 : i32, i32
  }
}

</mosaic_0001>

<bundles_post_ra>
// kernel: tpu_custom_call.1
= control target key start
LH: loop header
LB: loop body
LE: loop exit
PB: predicated region body
PF: predicated region fallthrough
CT: control target
= control target key end

     0   :  { %6 = vsyncpa [#allocation3], 0  ;;  %s342_s0 = inlined_call_operand.hbm [shape: f32[64,256], index: 0, kind: input, shape index: {}]   ;;  %s343_s1 = inlined_call_operand.hbm [shape: f32[64,256], index: 1, kind: output, shape index: {}]  }
   0x1   :  { %7 = vsyncpa [#allocation4], 0  ;;  %s218_s6 = smov [#allocation2]   ;;  %s170_s10 = scalar_lea.hbm %s342_s0, 2048 }
   0x2   :  { %s13_s7 = sshll.u32 %s218_s6, 4  ;;  %p171_p0 = scmp.ne.s32.totalorder %s342_s0, %s170_s10  ;;  %s14_s7 = int_to_ptr.vmem [resolvable:$true] %s13_s7 }
   0x3   :  { %p174_p1 = scmp.lt.u32.totalorder %s170_s10, %s342_s0 }
   0x5   :  { %p176_p2 = pnand %p174_p1, %p171_p0 }
   0x7   :  { %179 = shalt.err (!%p176_p2)
}
   0x8   :  { %s180_s15 = scalar_lea.vmem %s14_s7, 2048  ;;  %p185_p4 = scmp.lt.s32.totalorder %s14_s7, %s14_s7 }
   0x9   :  { %p181_p3 = scmp.ne.s32.totalorder %s14_s7, %s180_s15  ;;  %p186_p5 = scmp.lt.s32.totalorder %s180_s15, %s180_s15 }
   0xb   :  { %p187_p6 = por %p186_p5, %p185_p4 }
   0xd   :  { %p188_p7 = pnand %p187_p6, %p181_p3 }
   0xf   :  { %191 = shalt.err (!%p188_p7)
}
  0x10   :  { %s219_s16 = smov 256   ;;  %s220_s17 = smov 16  }
  0x11   :  { %19 = dma.hbm_to_vmem [thread:$0]  %s342_s0, 2048, %s14_s7, [#allocation3], %s219_s16, %s219_s16, %s220_s17  }
  0x12   :  { %214 = dma.done.wait [#allocation3], 2048  }
  0x13   :  { %215 = vsyncadd [#allocation3], 4294965248  ;;  %v247_v0 = vld [vmem:[#allocation2] sm:$0xff]  ;;  %v249_v1 = vld [vmem:[#allocation2 + $0x10] sm:$0xff]  ;;  %s221_s0 = smov [#allocation5]  }
  0x14   :  { %v251_v2 = vld [vmem:[#allocation2 + $0x20] sm:$0xff]  ;;  %v253_v3 = vld [vmem:[#allocation2 + $0x30] sm:$0xff]  ;;  %v271_v12 = vld [vmem:[#allocation2 + $0x8] sm:$0xff]  ;;  %s150_s20 = sshll.u32 %s221_s0, 4  ;;  %s151_s20 = int_to_ptr.vmem [resolvable:$true] %s150_s20 }
  0x15   :  { %v255_v4 = vld [vmem:[#allocation2 + $0x40] sm:$0xff]  ;;  %v257_v5 = vld [vmem:[#allocation2 + $0x50] sm:$0xff]  ;;  %v39_v6 = vmin.f32 %v247_v0, %v251_v2  ;;  %v65_v7 = vmax.f32 %v247_v0, %v251_v2  ;;  %v40_v10 = vmin.f32 %v249_v1, %v253_v3  ;;  %v66_v11 = vmax.f32 %v249_v1, %v253_v3  ;;  %v275_v15 = vld [vmem:[#allocation2 + $0x18] sm:$0xff]  ;;  %s192_s21 = scalar_lea.vmem %s151_s20, 2048  ;;  %p197_p9 = scmp.lt.s32.totalorder %s151_s20, %s151_s20 }
  0x16   :  { %v263_v8 = vld [vmem:[#allocation2 + $0x60] sm:$0xff]  ;;  %v265_v9 = vld [vmem:[#allocation2 + $0x70] sm:$0xff]  ;;  %v277_v16 = vld [vmem:[#allocation2 + $0x28] sm:$0xff]  ;;  %p193_p8 = scmp.ne.s32.totalorder %s151_s20, %s192_s21  ;;  %p198_p10 = scmp.lt.s32.totalorder %s192_s21, %s192_s21 }
  0x17   :  { %v41_v13 = vmin.f32 %v39_v6, %v255_v4  ;;  %v67_v14 = vmax.f32 %v65_v7, %v255_v4  ;;  %v279_v17 = vld [vmem:[#allocation2 + $0x38] sm:$0xff]  ;;  %v42_v18 = vmin.f32 %v40_v10, %v257_v5  ;;  %v68_v19 = vmax.f32 %v66_v11, %v257_v5  ;;  %v283_v20 = vld [vmem:[#allocation2 + $0x48] sm:$0xff] }
  0x18   :  { %v285_v21 = vld [vmem:[#allocation2 + $0x58] sm:$0xff]  ;;  %v52_v22 = vmin.f32 %v271_v12, %v277_v16  ;;  %v53_v23 = vmin.f32 %v275_v15, %v279_v17  ;;  %v293_v26 = vld [vmem:[#allocation2 + $0x68] sm:$0xff]  ;;  %v78_v28 = vmax.f32 %v271_v12, %v277_v16  ;;  %v79_v29 = vmax.f32 %v275_v15, %v279_v17  ;;  %p199_p11 = por %p198_p10, %p197_p9 }
  0x19   :  { %v43_v24 = vmin.f32 %v41_v13, %v263_v8  ;;  %v69_v25 = vmax.f32 %v67_v14, %v263_v8  ;;  %v295_v27 = vld [vmem:[#allocation2 + $0x78] sm:$0xff]  ;;  %v44_v30 = vmin.f32 %v42_v18, %v265_v9  ;;  %v70_v31 = vmax.f32 %v68_v19, %v265_v9 }
  0x1a   :  { %v54_v32 = vmin.f32 %v52_v22, %v283_v20  ;;  %v55_v33 = vmin.f32 %v53_v23, %v285_v21  ;;  %v80_v34 = vmax.f32 %v78_v28, %v283_v20  ;;  %v81_v35 = vmax.f32 %v79_v29, %v285_v21  ;;  %p200_p12 = pnand %p199_p11, %p193_p8 }
  0x1b   :  { %v45_v36 = vmin.f32 %v43_v24, %v44_v30  ;;  %v71_v37 = vmax.f32 %v69_v25, %v70_v31 }
  0x1c   :  { %v56_v38 = vmin.f32 %v54_v32, %v293_v26  ;;  %v57_v39 = vmin.f32 %v55_v33, %v295_v27  ;;  %v82_v40 = vmax.f32 %v80_v34, %v293_v26  ;;  %v83_v41 = vmax.f32 %v81_v35, %v295_v27 }
  0x1d   :  { %v46_v42 = vrot.slane %v45_v36, 4  ;;  %v72_v43 = vrot.slane %v71_v37, 4 }
  0x1e   :  { %v58_v44 = vmin.f32 %v56_v38, %v57_v39  ;;  %v84_v45 = vmax.f32 %v82_v40, %v83_v41 }
  0x1f   :  { %v47_v46 = vmin.f32 %v45_v36, %v46_v42  ;;  %v73_v47 = vmax.f32 %v71_v37, %v72_v43 }
  0x20   :  { %v59_v48 = vrot.slane %v58_v44, 4  ;;  %v85_v49 = vrot.slane %v84_v45, 4 }
  0x21   :  { %v48_v50 = vrot.slane %v47_v46, 2  ;;  %v74_v51 = vrot.slane %v73_v47, 2 }
  0x22   :  { %v60_v52 = vmin.f32 %v58_v44, %v59_v48  ;;  %v86_v53 = vmax.f32 %v84_v45, %v85_v49 }
  0x23   :  { %v49_v54 = vmin.f32 %v47_v46, %v48_v50  ;;  %v75_v55 = vmax.f32 %v73_v47, %v74_v51 }
  0x24   :  { %v61_v56 = vrot.slane %v60_v52, 2  ;;  %v87_v57 = vrot.slane %v86_v53, 2 }
  0x25   :  { %v50_v58 = vrot.slane %v49_v54, 1  ;;  %v76_v59 = vrot.slane %v75_v55, 1 }
  0x26   :  { %v62_v60 = vmin.f32 %v60_v52, %v61_v56  ;;  %v88_v61 = vmax.f32 %v86_v53, %v87_v57 }
  0x27   :  { %v51_v62 = vmin.f32 %v49_v54, %v50_v58  ;;  %v77_v63 = vmax.f32 %v75_v55, %v76_v59 }
  0x28   :  { %v63_v6 = vrot.slane %v62_v60, 1  ;;  %v89_v7 = vrot.slane %v88_v61, 1 }
  0x29   :  { %v91_v10 = vsub.f32 %v77_v63, %v51_v62  ;;  %v97_v18 = vsub.f32 %v247_v0, %v51_v62  ;;  %v99_v19 = vsub.f32 %v249_v1, %v51_v62  ;;  %v101_v22 = vsub.f32 %v251_v2, %v51_v62 }
  0x2a   :  { %v64_v11 = vmin.f32 %v62_v60, %v63_v6  ;;  %v90_v13 = vmax.f32 %v88_v61, %v89_v7  ;;  %v103_v23 = vsub.f32 %v253_v3, %v51_v62  ;;  %v105_v24 = vsub.f32 %v255_v4, %v51_v62 }
  0x2b   :  { %166 = vrcp.f32 %v91_v10  ;;  %v107_v25 = vsub.f32 %v257_v5, %v51_v62  ;;  %v109_v28 = vsub.f32 %v263_v8, %v51_v62  ;;  %v111_v29 = vsub.f32 %v265_v9, %v51_v62 }
  0x2c   :  { %v92_v14 = vsub.f32 %v90_v13, %v64_v11  ;;  %v98_v30 = vsub.f32 %v271_v12, %v64_v11  ;;  %v100_v31 = vsub.f32 %v275_v15, %v64_v11  ;;  %v102_v0 = vsub.f32 %v277_v16, %v64_v11 }
  0x2d   :  { %v104_v1 = vsub.f32 %v279_v17, %v64_v11  ;;  %v106_v2 = vsub.f32 %v283_v20, %v64_v11  ;;  %v108_v3 = vsub.f32 %v285_v21, %v64_v11  ;;  %v110_v4 = vsub.f32 %v293_v26, %v64_v11 }
  0x2e   :  { %168 = vrcp.f32 %v92_v14  ;;  %v112_v5 = vsub.f32 %v295_v27, %v64_v11 }
  0x35   :  { %v167_v32 = vpop.eup %166 }
  0x36   :  { %v113_v8 = vmul.f32 %v167_v32, %v97_v18  ;;  %v115_v33 = vmul.f32 %v167_v32, %v99_v19  ;;  %v117_v9 = vmul.f32 %v167_v32, %v101_v22  ;;  %v119_v34 = vmul.f32 %v167_v32, %v103_v23 }
  0x37   :  { %v121_v12 = vmul.f32 %v167_v32, %v105_v24  ;;  %v123_v35 = vmul.f32 %v167_v32, %v107_v25  ;;  %v125_v15 = vmul.f32 %v167_v32, %v109_v28  ;;  %v127_v36 = vmul.f32 %v167_v32, %v111_v29 }
  0x38   :  { %v169_v16 = vpop.eup %168  ;;  %129 = vst [vmem:[#allocation5] sm:$0xff] %v113_v8  ;;  %131 = vst [vmem:[#allocation5 + $0x10] sm:$0xff] %v115_v33 }
  0x39   :  { %133 = vst [vmem:[#allocation5 + $0x20] sm:$0xff] %v117_v9  ;;  %135 = vst [vmem:[#allocation5 + $0x30] sm:$0xff] %v119_v34  ;;  %v114_v17 = vmul.f32 %v169_v16, %v98_v30  ;;  %v116_v20 = vmul.f32 %v169_v16, %v100_v31  ;;  %v118_v21 = vmul.f32 %v169_v16, %v102_v0 }
  0x3a   :  { %v120_v26 = vmul.f32 %v169_v16, %v104_v1  ;;  %137 = vst [vmem:[#allocation5 + $0x40] sm:$0xff] %v121_v12  ;;  %139 = vst [vmem:[#allocation5 + $0x50] sm:$0xff] %v123_v35  ;;  %v122_v27 = vmul.f32 %v169_v16, %v106_v2  ;;  %v124_v37 = vmul.f32 %v169_v16, %v108_v3 }
  0x3b   :  { %141 = vst [vmem:[#allocation5 + $0x60] sm:$0xff] %v125_v15  ;;  %143 = vst [vmem:[#allocation5 + $0x70] sm:$0xff] %v127_v36  ;;  %v126_v38 = vmul.f32 %v169_v16, %v110_v4  ;;  %v128_v39 = vmul.f32 %v169_v16, %v112_v5 }
  0x3c   :  { %130 = vst [vmem:[#allocation5 + $0x8] sm:$0xff] %v114_v17  ;;  %132 = vst [vmem:[#allocation5 + $0x18] sm:$0xff] %v116_v20 }
  0x3d   :  { %134 = vst [vmem:[#allocation5 + $0x28] sm:$0xff] %v118_v21  ;;  %136 = vst [vmem:[#allocation5 + $0x38] sm:$0xff] %v120_v26 }
  0x3e   :  { %138 = vst [vmem:[#allocation5 + $0x48] sm:$0xff] %v122_v27  ;;  %140 = vst [vmem:[#allocation5 + $0x58] sm:$0xff] %v124_v37 }
  0x3f   :  { %142 = vst [vmem:[#allocation5 + $0x68] sm:$0xff] %v126_v38  ;;  %144 = vst [vmem:[#allocation5 + $0x78] sm:$0xff] %v128_v39 }
  0x40   :  { %203 = shalt.err (!%p200_p12)
}
  0x41   :  { %s204_s24 = scalar_lea.hbm %s343_s1, 2048 }
  0x42   :  { %p205_p13 = scmp.ne.s32.totalorder %s343_s1, %s204_s24  ;;  %p208_p0 = scmp.lt.u32.totalorder %s204_s24, %s343_s1 }
  0x44   :  { %p210_p1 = pnand %p208_p0, %p205_p13 }
  0x46   :  { %213 = shalt.err (!%p210_p1)
}
  0x47   :  { %156 = dma.vmem_to_hbm [thread:$0]  %s151_s20, 2048, %s343_s1, [#allocation4], %s219_s16, %s219_s16, %s220_s17  }
  0x48   :  { %216 = dma.done.wait [#allocation4], 2048  }
  0x49   :  { %217 = vsyncadd [#allocation4], 4294965248 }
  0x4a   :  { %160 = vsyncpa [#allocation3], 1 }
  0x4b   :  { %161 = vsyncpa [#allocation4], 1 }

</bundles_post_ra>
